<compile_context>
chip_gen: v5e
topology: v5e:2x2
jax: 0.10.0
libtpu: 0.0.40
codegen_flags: <defaults>
</compile_context>

<pallas_src>
import functools

import jax
import jax.numpy as jnp
from jax.experimental import pallas as pl
from jax.experimental.pallas import tpu as pltpu


def _fused_sage_kernel(*refs, layer_dims):
    """All SAGEConv(mean) layers fused, whole graph resident in VMEM.

    refs = (a_ref, x_ref, ws_0..ws_{L-1}, wn_0..wn_{L-1}, b_0..b_{L-1}, o_ref)
      a_ref : [N, N]        row-normalized adjacency (mean aggregation)
      x_ref : [N, F0]       input node features
      ws_l  : [Fin_l, Fout_l]  self-projection weight
      wn_l  : [Fin_l, Fout_l]  neighbor-projection weight
      b_l   : [1, Fout_l]   bias
      o_ref : [N, Fout_last] final output node features
    """
    n_layers = len(layer_dims)
    a_ref = refs[0]
    x_ref = refs[1]
    ws_refs = refs[2:2 + n_layers]
    wn_refs = refs[2 + n_layers:2 + 2 * n_layers]
    b_refs = refs[2 + 2 * n_layers:2 + 3 * n_layers]
    o_ref = refs[2 + 3 * n_layers]

    # Adjacency is loaded once and reused by every layer (single DMA).
    a = a_ref[...]

    h = x_ref[...]
    for l, (f_in, f_out) in enumerate(layer_dims):
        w_self = ws_refs[l][...]
        w_neigh = wn_refs[l][...]
        b = b_refs[l][...]

        # Self projection.
        h_self = jnp.dot(h, w_self, preferred_element_type=jnp.float32)

        # Neighbor branch: mean aggregation commutes with the linear map, so
        # pick the order that minimizes the width of the N x N matmul
        # (same rule as DGL SAGEConv's `lin_before_mp`).
        if f_in > f_out:
            proj = jnp.dot(h, w_neigh, preferred_element_type=jnp.float32)
            h_neigh = jnp.dot(a, proj, preferred_element_type=jnp.float32)
        else:
            agg = jnp.dot(a, h, preferred_element_type=jnp.float32)
            h_neigh = jnp.dot(agg, w_neigh, preferred_element_type=jnp.float32)

        out = h_self + h_neigh + b

        if l != n_layers - 1:
            # ReLU between layers; dropout is eval-mode identity.
            h = jnp.maximum(out, 0.0)
        else:
            o_ref[...] = out.astype(o_ref.dtype)


def model_forward(a_norm, x, params):
    """GraphSAGE forward: stack of SAGEConv(mean) layers fused in one kernel.

    Dropout is eval-mode (identity) for deterministic comparison.
    """
    # TODO(synk): training-mode dropout (stochastic masking via pltpu.prng_*) not
    # implemented; eval-mode identity used.
    # TODO(synk): for large graphs, tile the per-layer aggregation over rows of
    # A (grid over N, 'parallel' for v7x dual-TC) instead of whole-graph-in-VMEM.
    n, in_feats = x.shape
    n_layers = len(params)
    layer_dims = tuple((w_self.shape[0], w_self.shape[1]) for w_self, _, _ in params)
    f_out_final = layer_dims[-1][1]

    w_selfs = [w_self.astype(jnp.float32) for w_self, _, _ in params]
    w_neighs = [w_neigh.astype(jnp.float32) for _, w_neigh, _ in params]
    biases = [b.reshape(1, -1).astype(jnp.float32) for _, _, b in params]

    def full_spec(shape):
        # whole-array block -> the (8,128) divisibility rule does not apply
        return pl.BlockSpec(shape, lambda: tuple(0 for _ in shape))

    kernel = functools.partial(_fused_sage_kernel, layer_dims=layer_dims)
    in_specs = (
        [full_spec((n, n)), full_spec((n, in_feats))]
        + [full_spec(w.shape) for w in w_selfs]
        + [full_spec(w.shape) for w in w_neighs]
        + [full_spec(b.shape) for b in biases]
    )
    return pl.pallas_call(
        kernel,
        out_shape=jax.ShapeDtypeStruct((n, f_out_final), jnp.float32),
        grid_spec=pltpu.PrefetchScalarGridSpec(
            num_scalar_prefetch=0,
            grid=(),
            in_specs=in_specs,
            out_specs=full_spec((n, f_out_final)),
            scratch_shapes=[],
        ),
    )(a_norm, x, *w_selfs, *w_neighs, *biases)


def make_params(key, in_feats, n_hidden, n_classes, n_layers):
    dims = [in_feats] + [n_hidden] * (n_layers - 1) + [n_classes]
    params = []
    for l in range(n_layers):
        f_in, f_out = dims[l], dims[l + 1]
        key, k1, k2, k3 = jax.random.split(key, 4)
        scale = 1.0 / jnp.sqrt(jnp.float32(f_in))
        w_self = jax.random.uniform(k1, (f_in, f_out), jnp.float32, -scale, scale)
        w_neigh = jax.random.uniform(k2, (f_in, f_out), jnp.float32, -scale, scale)
        b = jax.random.uniform(k3, (1, f_out), jnp.float32, -scale, scale)
        params.append((w_self, w_neigh, b))
    return params


def reference_forward(a_norm, x, params):
    """Pure-JAX reference for correctness check."""
    h = x
    for l, (w_self, w_neigh, b) in enumerate(params):
        h_neigh = a_norm @ h
        h = h @ w_self + h_neigh @ w_neigh + b
        if l != len(params) - 1:
            h = jnp.maximum(h, 0.0)
    return h


if __name__ == "__main__":
    # small synthetic graph + features
    N = 128          # nodes
    IN_FEATS = 32
    N_HIDDEN = 64
    N_CLASSES = 16
    N_LAYERS = 3

    key = jax.random.PRNGKey(0)
    k_adj, k_x, k_p = jax.random.split(key, 3)

    # random sparse-ish adjacency, row-normalized for 'mean' aggregation
    adj = (jax.random.uniform(k_adj, (N, N)) < 0.05).astype(jnp.float32)
    deg = jnp.maximum(adj.sum(axis=1, keepdims=True), 1.0)
    a_norm = adj / deg

    x = jax.random.normal(k_x, (N, IN_FEATS), jnp.float32)
    params = make_params(k_p, IN_FEATS, N_HIDDEN, N_CLASSES, N_LAYERS)

    out = model_forward(a_norm, x, params)
    out = jax.block_until_ready(out)

    ref = reference_forward(a_norm, x, params)
    assert out.shape == (N, N_CLASSES)
    assert jnp.allclose(out, ref, atol=5e-4, rtol=5e-4), "mismatch vs reference"

    print("KERNEL_OK")
</pallas_src>

<mosaic_0001>
module attributes {stable_mosaic.version = 11 : i64} {
  func.func @_fused_sage_kernel(%arg0: memref<128x128xf32, #tpu.memory_space<vmem>>, %arg1: memref<128x32xf32, #tpu.memory_space<vmem>>, %arg2: memref<32x64xf32, #tpu.memory_space<vmem>>, %arg3: memref<64x64xf32, #tpu.memory_space<vmem>>, %arg4: memref<64x16xf32, #tpu.memory_space<vmem>>, %arg5: memref<32x64xf32, #tpu.memory_space<vmem>>, %arg6: memref<64x64xf32, #tpu.memory_space<vmem>>, %arg7: memref<64x16xf32, #tpu.memory_space<vmem>>, %arg8: memref<1x64xf32, #tpu.memory_space<vmem>>, %arg9: memref<1x64xf32, #tpu.memory_space<vmem>>, %arg10: memref<1x16xf32, #tpu.memory_space<vmem>>, %arg11: memref<128x16xf32, #tpu.memory_space<vmem>>) attributes {dimension_semantics = [], scalar_prefetch = 0 : i64, scratch_operands = 0 : i64, tpu.core_type = #tpu.core_type<tc>} {
    %c0 = arith.constant 0 : index
    %c0_0 = arith.constant 0 : index
    %0 = vector.load %arg0[%c0, %c0_0] : memref<128x128xf32, #tpu.memory_space<vmem>>, vector<128x128xf32>
    %c0_1 = arith.constant 0 : index
    %c0_2 = arith.constant 0 : index
    %1 = vector.load %arg1[%c0_1, %c0_2] : memref<128x32xf32, #tpu.memory_space<vmem>>, vector<128x32xf32>
    %c0_3 = arith.constant 0 : index
    %c0_4 = arith.constant 0 : index
    %2 = vector.load %arg2[%c0_3, %c0_4] : memref<32x64xf32, #tpu.memory_space<vmem>>, vector<32x64xf32>
    %c0_5 = arith.constant 0 : index
    %c0_6 = arith.constant 0 : index
    %3 = vector.load %arg5[%c0_5, %c0_6] : memref<32x64xf32, #tpu.memory_space<vmem>>, vector<32x64xf32>
    %c0_7 = arith.constant 0 : index
    %c0_8 = arith.constant 0 : index
    %4 = vector.load %arg8[%c0_7, %c0_8] : memref<1x64xf32, #tpu.memory_space<vmem>>, vector<1x64xf32>
    %cst = arith.constant dense<0.000000e+00> : vector<128x64xf32>
    %5 = tpu.matmul %1, %2, %cst {dimension_numbers = #tpu.dot_dimension_numbers<[1], [0], [0], [1], [0, 0, 1, 1], [], []>} : vector<128x32xf32>, vector<32x64xf32>, vector<128x64xf32> -> vector<128x64xf32>
    %cst_9 = arith.constant dense<0.000000e+00> : vector<128x32xf32>
    %6 = tpu.matmul %0, %1, %cst_9 {dimension_numbers = #tpu.dot_dimension_numbers<[1], [0], [0], [1], [0, 0, 1, 1], [], []>} : vector<128x128xf32>, vector<128x32xf32>, vector<128x32xf32> -> vector<128x32xf32>
    %cst_10 = arith.constant dense<0.000000e+00> : vector<128x64xf32>
    %7 = tpu.matmul %6, %3, %cst_10 {dimension_numbers = #tpu.dot_dimension_numbers<[1], [0], [0], [1], [0, 0, 1, 1], [], []>} : vector<128x32xf32>, vector<32x64xf32>, vector<128x64xf32> -> vector<128x64xf32>
    %8 = arith.addf %5, %7 : vector<128x64xf32>
    %9 = vector.broadcast %4 : vector<1x64xf32> to vector<128x64xf32>
    %10 = arith.addf %8, %9 : vector<128x64xf32>
    %cst_11 = arith.constant 0.000000e+00 : f32
    %11 = vector.broadcast %cst_11 : f32 to vector<128x64xf32>
    %12 = arith.maximumf %10, %11 : vector<128x64xf32>
    %c0_12 = arith.constant 0 : index
    %c0_13 = arith.constant 0 : index
    %13 = vector.load %arg3[%c0_12, %c0_13] : memref<64x64xf32, #tpu.memory_space<vmem>>, vector<64x64xf32>
    %c0_14 = arith.constant 0 : index
    %c0_15 = arith.constant 0 : index
    %14 = vector.load %arg6[%c0_14, %c0_15] : memref<64x64xf32, #tpu.memory_space<vmem>>, vector<64x64xf32>
    %c0_16 = arith.constant 0 : index
    %c0_17 = arith.constant 0 : index
    %15 = vector.load %arg9[%c0_16, %c0_17] : memref<1x64xf32, #tpu.memory_space<vmem>>, vector<1x64xf32>
    %cst_18 = arith.constant dense<0.000000e+00> : vector<128x64xf32>
    %16 = tpu.matmul %12, %13, %cst_18 {dimension_numbers = #tpu.dot_dimension_numbers<[1], [0], [0], [1], [0, 0, 1, 1], [], []>} : vector<128x64xf32>, vector<64x64xf32>, vector<128x64xf32> -> vector<128x64xf32>
    %cst_19 = arith.constant dense<0.000000e+00> : vector<128x64xf32>
    %17 = tpu.matmul %0, %12, %cst_19 {dimension_numbers = #tpu.dot_dimension_numbers<[1], [0], [0], [1], [0, 0, 1, 1], [], []>} : vector<128x128xf32>, vector<128x64xf32>, vector<128x64xf32> -> vector<128x64xf32>
    %cst_20 = arith.constant dense<0.000000e+00> : vector<128x64xf32>
    %18 = tpu.matmul %17, %14, %cst_20 {dimension_numbers = #tpu.dot_dimension_numbers<[1], [0], [0], [1], [0, 0, 1, 1], [], []>} : vector<128x64xf32>, vector<64x64xf32>, vector<128x64xf32> -> vector<128x64xf32>
    %19 = arith.addf %16, %18 : vector<128x64xf32>
    %20 = vector.broadcast %15 : vector<1x64xf32> to vector<128x64xf32>
    %21 = arith.addf %19, %20 : vector<128x64xf32>
    %cst_21 = arith.constant 0.000000e+00 : f32
    %22 = vector.broadcast %cst_21 : f32 to vector<128x64xf32>
    %23 = arith.maximumf %21, %22 : vector<128x64xf32>
    %c0_22 = arith.constant 0 : index
    %c0_23 = arith.constant 0 : index
    %24 = vector.load %arg4[%c0_22, %c0_23] : memref<64x16xf32, #tpu.memory_space<vmem>>, vector<64x16xf32>
    %c0_24 = arith.constant 0 : index
    %c0_25 = arith.constant 0 : index
    %25 = vector.load %arg7[%c0_24, %c0_25] : memref<64x16xf32, #tpu.memory_space<vmem>>, vector<64x16xf32>
    %c0_26 = arith.constant 0 : index
    %c0_27 = arith.constant 0 : index
    %26 = vector.load %arg10[%c0_26, %c0_27] : memref<1x16xf32, #tpu.memory_space<vmem>>, vector<1x16xf32>
    %cst_28 = arith.constant dense<0.000000e+00> : vector<128x16xf32>
    %27 = tpu.matmul %23, %24, %cst_28 {dimension_numbers = #tpu.dot_dimension_numbers<[1], [0], [0], [1], [0, 0, 1, 1], [], []>} : vector<128x64xf32>, vector<64x16xf32>, vector<128x16xf32> -> vector<128x16xf32>
    %cst_29 = arith.constant dense<0.000000e+00> : vector<128x16xf32>
    %28 = tpu.matmul %23, %25, %cst_29 {dimension_numbers = #tpu.dot_dimension_numbers<[1], [0], [0], [1], [0, 0, 1, 1], [], []>} : vector<128x64xf32>, vector<64x16xf32>, vector<128x16xf32> -> vector<128x16xf32>
    %cst_30 = arith.constant dense<0.000000e+00> : vector<128x16xf32>
    %29 = tpu.matmul %0, %28, %cst_30 {dimension_numbers = #tpu.dot_dimension_numbers<[1], [0], [0], [1], [0, 0, 1, 1], [], []>} : vector<128x128xf32>, vector<128x16xf32>, vector<128x16xf32> -> vector<128x16xf32>
    %30 = arith.addf %27, %29 : vector<128x16xf32>
    %31 = vector.broadcast %26 : vector<1x16xf32> to vector<128x16xf32>
    %32 = arith.addf %30, %31 : vector<128x16xf32>
    %c0_31 = arith.constant 0 : index
    %c0_32 = arith.constant 0 : index
    %33 = vector.load %arg11[%c0_31, %c0_32] : memref<128x16xf32, #tpu.memory_space<vmem>>, vector<128x16xf32>
    tpu.vector_store %arg11[%c0_31, %c0_32], %32 {strides = array<i32>} : memref<128x16xf32, #tpu.memory_space<vmem>>, vector<128x16xf32>,
    return
  }
}

</mosaic_0001>

<bundles_post_ra>
// kernel: tpu_custom_call.1
= control target key start
LH: loop header
LB: loop body
LE: loop exit
PB: predicated region body
PF: predicated region fallthrough
CT: control target
= control target key end

     0   :  { %16 = vsyncpa [#allocation3], 0  ;;  %s1945_s0 = inlined_call_operand.vmem [shape: f32[128,128], index: 0, kind: input, shape index: {}]   ;;  %s1946_s1 = inlined_call_operand.vmem [shape: f32[128,32], index: 1, kind: input, shape index: {}]   ;;  %s1947_s2 = inlined_call_operand.hbm [shape: f32[32,64], index: 2, kind: input, shape index: {}]   ;;  %s1948_s3 = inlined_call_operand.vmem [shape: f32[64,64], index: 3, kind: input, shape index: {}]   ;;  %s1949_s4 = inlined_call_operand.vmem [shape: f32[64,16], index: 4, kind: input, shape index: {}]   ;;  %s1950_s5 = inlined_call_operand.hbm [shape: f32[32,64], index: 5, kind: input, shape index: {}]   ;;  %s1951_s6 = inlined_call_operand.vmem [shape: f32[64,64], index: 6, kind: input, shape index: {}]   ;;  %s1952_s7 = inlined_call_operand.vmem [shape: f32[64,16], index: 7, kind: input, shape index: {}]   ;;  %s1953_s8 = inlined_call_operand.vmem [shape: f32[1,64], index: 8, kind: input, shape index: {}]   ;;  %s1954_s9 = inlined_call_operand.vmem [shape: f32[1,64], index: 9, kind: input, shape index: {}]   ;;  %s1955_s10 = inlined_call_operand.vmem [shape: f32[1,16], index: 10, kind: input, shape index: {}]   ;;  %s1956_s11 = inlined_call_operand.vmem [shape: f32[128,16], index: 11, kind: output, shape index: {}]  }
   0x1   :  { %s26_s19 = sshll.u32 %s1947_s2, 4  ;;  %s27_s19 = int_to_ptr.hbm [resolvable:$true] %s26_s19 }
   0x2   :  { %17 = vsyncpa [#allocation5], 0  ;;  %s1255_s20 = smov [#allocation2]   ;;  %s43_s24 = sshll.u32 %s1950_s5, 4  ;;  %s44_s24 = int_to_ptr.hbm [resolvable:$true] %s43_s24 }
   0x3   :  { %s28_s21 = sshll.u32 %s1255_s20, 4  ;;  %s1256_s25 = smov 128   ;;  %s29_s21 = int_to_ptr.vmem [resolvable:$true] %s28_s21 }
   0x4   :  { %s1257_s26 = smov 8   ;;  %s1258_s27 = smov [#allocation4]  }
   0x5   :  { %34 = dma.hbm_to_vmem [thread:$0]  %s27_s19, 512, %s29_s21, [#allocation3], %s1256_s25, %s1256_s25, %s1257_s26  }
   0x6   :  { %s45_s28 = sshll.u32 %s1258_s27, 4  ;;  %s46_s28 = int_to_ptr.vmem [resolvable:$true] %s45_s28 }
   0x7   :  { %51 = dma.hbm_to_vmem [thread:$0]  %s44_s24, 512, %s46_s28, [#allocation5], %s1256_s25, %s1256_s25, %s1257_s26  }
   0x8   :  { %1251 = dma.done.wait [#allocation3], 512  }
   0x9   :  { %1252 = vsyncadd [#allocation3], 4294966784 }
   0xa   :  { %1253 = dma.done.wait [#allocation5], 512  }
   0xb   :  { %1254 = vsyncadd [#allocation5], 4294966784  ;;  %v1328_v0 = vld [vmem:[%s1946_s1 + $0x78] sm:$0xff]  ;;  %v1333_v1 = vld [vmem:[%s1946_s1 + $0x70] sm:$0xff]  ;;  %vm176_vm0 = vcmask 261120   ;;  %vm520_vm1 = vcmask 523264  }
   0xc   :  { %111 = vmatpush.msra.mxu0 %v1328_v0  ;;  %v1339_v2 = vld [vmem:[%s1946_s1 + $0x68] sm:$0xff]  ;;  %v1345_v3 = vld [vmem:[%s1946_s1 + $0x60] sm:$0xff]  ;;  %v1351_v4 = vld [vmem:[%s1946_s1 + $0x58] sm:$0xff]  ;;  %vm1061_vm2 = vcmask 130048  }
   0xd   :  { %v1357_v5 = vld [vmem:[%s1946_s1 + $0x50] sm:$0xff]  ;;  %v1363_v6 = vld [vmem:[%s1946_s1 + $0x48] sm:$0xff]  ;;  %v1369_v7 = vld [vmem:[%s1946_s1 + $0x40] sm:$0xff] }
   0xe   :  { %112 = vmatpush.msra.mxu0 %v1333_v1  ;;  %v1375_v8 = vld [vmem:[%s1946_s1 + $0x38] sm:$0xff]  ;;  %v1381_v9 = vld [vmem:[%s1946_s1 + $0x30] sm:$0xff]  ;;  %v1387_v10 = vld [vmem:[%s1946_s1 + $0x28] sm:$0xff] }
   0xf   :  { %v1393_v11 = vld [vmem:[%s1946_s1 + $0x20] sm:$0xff]  ;;  %v1399_v12 = vld [vmem:[%s1946_s1 + $0x18] sm:$0xff]  ;;  %v1405_v13 = vld [vmem:[%s1946_s1 + $0x10] sm:$0xff] }
  0x10   :  { %113 = vmatpush.msra.mxu0 %v1339_v2  ;;  %v1411_v14 = vld [vmem:[%s1946_s1 + $0x8] sm:$0xff]  ;;  %v1417_v15 = vld [vmem:[%s1946_s1] sm:$0xff]  ;;  %v1436_v18 = vld [vmem:[%s1945_s0 + $0x10] sm:$0xff] }
  0x11   :  { %v1423_v16 = vld [vmem:[%s1945_s0] sm:$0xff]  ;;  %v1430_v17 = vld [vmem:[%s1945_s0 + $0x8] sm:$0xff]  ;;  %v1442_v19 = vld [vmem:[%s1945_s0 + $0x18] sm:$0xff] }
  0x12   :  { %114 = vmatpush.msra.mxu0 %v1345_v3  ;;  %v1448_v20 = vld [vmem:[%s1945_s0 + $0x20] sm:$0xff]  ;;  %v1454_v21 = vld [vmem:[%s1945_s0 + $0x28] sm:$0xff]  ;;  %v1460_v22 = vld [vmem:[%s1945_s0 + $0x30] sm:$0xff] }
  0x13   :  { %v1466_v23 = vld [vmem:[%s1945_s0 + $0x38] sm:$0xff]  ;;  %v108_v25 = vld [vmem:[#allocation4 + $0x10] sm:$0xff]  ;;  %v107_v26 = vld [vmem:[#allocation4 + $0x8] sm:$0xff] }
  0x14   :  { %115 = vmatpush.msra.mxu0 %v1351_v4  ;;  %v109_v24 = vld [vmem:[#allocation4 + $0x18] sm:$0xff]  ;;  %v1472_v27 = vld [vmem:[%s1945_s0 + $0x40] sm:$0xff]  ;;  %v1478_v28 = vld [vmem:[%s1945_s0 + $0x48] sm:$0xff] }
  0x15   :  { %237 = vmatpush.msra.mxu1 %v109_v24  ;;  %1180 = vmatpush.msra.mxu2 %v109_v24  ;;  %v1484_v29 = vld [vmem:[%s1945_s0 + $0x50] sm:$0xff]  ;;  %v1490_v30 = vld [vmem:[%s1945_s0 + $0x58] sm:$0xff]  ;;  %v106_v31 = vld [vmem:[#allocation4] sm:$0xff] }
  0x16   :  { %116 = vmatpush.msra.mxu0 %v1357_v5  ;;  %1181 = vmatpush.msra.mxu3 %v109_v24  ;;  %v1501_v37 = vld [vmem:[%s1945_s0 + $0x60] sm:$0xff]  ;;  %v1508_v39 = vld [vmem:[%s1945_s0 + $0x68] sm:$0xff]  ;;  %v1515_v41 = vld [vmem:[%s1945_s0 + $0x70] sm:$0xff] }
  0x17   :  { %238 = vmatpush.msra.mxu1 %v108_v25  ;;  %1182 = vmatpush.msra.mxu2 %v108_v25  ;;  %v105_v43 = vld [vmem:[#allocation2 + $0x18] sm:$0xff]  ;;  %v104_v45 = vld [vmem:[#allocation2 + $0x10] sm:$0xff]  ;;  %v103_v46 = vld [vmem:[#allocation2 + $0x8] sm:$0xff] }
  0x18   :  { %117 = vmatpush.msra.mxu0 %v1363_v6  ;;  %1183 = vmatpush.msra.mxu3 %v108_v25  ;;  %v1522_v44 = vld [vmem:[%s1945_s0 + $0x78] sm:$0xff]  ;;  %v102_v47 = vld [vmem:[#allocation2] sm:$0xff]  ;;  %v444_v59 = vld [vmem:[%s1948_s3 + $0x30] sm:$0xff] }
  0x19   :  { %239 = vmatpush.msra.mxu1 %v107_v26  ;;  %1184 = vmatpush.msra.mxu2 %v107_v26  ;;  %v445_v57 = vld [vmem:[%s1948_s3 + $0x38] sm:$0xff]  ;;  %v443_v60 = vld [vmem:[%s1948_s3 + $0x28] sm:$0xff]  ;;  %v442_v61 = vld [vmem:[%s1948_s3 + $0x20] sm:$0xff] }
  0x1a   :  { %118 = vmatpush.msra.mxu0 %v1369_v7  ;;  %1185 = vmatpush.msra.mxu3 %v107_v26  ;;  %v441_v62 = vld [vmem:[%s1948_s3 + $0x18] sm:$0xff] }
  0x1b   :  { %240 = vmatpush.msra.mxu1 %v106_v31  ;;  %1186 = vmatpush.msra.mxu2 %v106_v31 }
  0x1c   :  { %119 = vmatpush.msra.mxu0 %v1375_v8  ;;  %1187 = vmatpush.msra.mxu3 %v106_v31 }
  0x1d   :  { %350 = vmatpush.msrb.mxu2 %v105_v43 }
  0x1e   :  { %120 = vmatpush.msra.mxu0 %v1381_v9 }
  0x1f   :  { %351 = vmatpush.msrb.mxu2 %v104_v45 }
  0x20   :  { %121 = vmatpush.msra.mxu0 %v1387_v10 }
  0x21   :  { %352 = vmatpush.msrb.mxu2 %v103_v46 }
  0x22   :  { %122 = vmatpush.msra.mxu0 %v1393_v11 }
  0x23   :  { %353 = vmatpush.msrb.mxu2 %v102_v47 }
  0x24   :  { %123 = vmatpush.msra.mxu0 %v1399_v12 }
  0x26   :  { %124 = vmatpush.msra.mxu0 %v1405_v13 }
  0x28   :  { %125 = vmatpush.msra.mxu0 %v1411_v14 }
  0x2a   :  { %126 = vmatpush.msra.mxu0 %v1417_v15 }
  0x2b   :  { %127 = vmatmul.f32.vlgmr.msra.gmra.mxu0 %v1423_v16 }
  0x33   :  { %130 = vmatmul.f32.gmra.mxu0 %v1430_v17 }
  0x3b   :  { %133 = vmatmul.f32.gmra.mxu0 %v1436_v18 }
  0x43   :  { %136 = vmatmul.f32.gmra.mxu0 %v1442_v19 }
  0x4b   :  { %139 = vmatmul.f32.gmra.mxu0 %v1448_v20 }
  0x53   :  { %142 = vmatmul.f32.gmra.mxu0 %v1454_v21 }
  0x5b   :  { %145 = vmatmul.f32.gmra.mxu0 %v1460_v22 }
  0x63   :  { %148 = vmatmul.f32.gmra.mxu0 %v1466_v23 }
  0x6b   :  { %151 = vmatmul.f32.gmra.mxu0 %v1472_v27 }
  0x73   :  { %154 = vmatmul.f32.gmra.mxu0 %v1478_v28 }
  0x7b   :  { %157 = vmatmul.f32.gmra.mxu0 %v1484_v29 }
  0x83   :  { %160 = vmatmul.f32.gmra.mxu0 %v1490_v30 }
  0x8b   :  { %163 = vmatmul.f32.gmra.mxu0 %v1501_v37 }
  0x93   :  { %166 = vmatmul.f32.gmra.mxu0 %v1508_v39 }
  0x9b   :  { %169 = vmatmul.f32.gmra.mxu0 %v1515_v41 }
  0xa3   :  { %172 = vmatmul.f32.gmra.mxu0 %v1522_v44 }
  0xa8   :  { %v128_v32 = vpop.f32.mrf.mxu0 }
  0xa9   :  { %1084 = vmatmul.msk.f32.vlgmr.msra.gmra.mxu1 %vm176_vm0, %v128_v32 }
  0xb0   :  { %v131_v33 = vpop.f32.mrf.mxu0 }
  0xb1   :  { %1085 = vmatmul.msk.f32.gmra.mxu1 %vm176_vm0, %v131_v33 }
  0xb8   :  { %v134_v34 = vpop.f32.mrf.mxu0 }
  0xb9   :  { %1086 = vmatmul.msk.f32.gmra.mxu1 %vm176_vm0, %v134_v34 }
  0xc0   :  { %v137_v35 = vpop.f32.mrf.mxu0 }
  0xc1   :  { %1087 = vmatmul.msk.f32.gmra.mxu1 %vm176_vm0, %v137_v35 }
  0xc8   :  { %v140_v36 = vpop.f32.mrf.mxu0 }
  0xc9   :  { %1088 = vmatmul.msk.f32.gmra.mxu1 %vm176_vm0, %v140_v36 }
  0xd0   :  { %v143_v38 = vpop.f32.mrf.mxu0 }
  0xd1   :  { %1089 = vmatmul.msk.f32.gmra.mxu1 %vm176_vm0, %v143_v38 }
  0xd8   :  { %v146_v40 = vpop.f32.mrf.mxu0 }
  0xd9   :  { %1090 = vmatmul.msk.f32.vlgmr.msra.gmra.mxu2 %vm176_vm0, %v146_v40 }
  0xda   :  { %690 = vmatpush.msra.mxu2 %v445_v57 }
  0xdc   :  { %691 = vmatpush.msra.mxu2 %v444_v59 }
  0xde   :  { %692 = vmatpush.msra.mxu2 %v443_v60 }
  0xe0   :  { %v149_v42 = vpop.f32.mrf.mxu0  ;;  %693 = vmatpush.msra.mxu2 %v442_v61 }
  0xe1   :  { %1091 = vmatmul.msk.f32.gmra.mxu2 %vm176_vm0, %v149_v42 }
  0xe2   :  { %694 = vmatpush.msra.mxu2 %v441_v62 }
  0xe8   :  { %v152_v48 = vpop.f32.mrf.mxu0 }
  0xe9   :  { %1092 = vmatmul.msk.f32.gmra.mxu2 %vm176_vm0, %v152_v48 }
  0xf0   :  { %v155_v49 = vpop.f32.mrf.mxu0 }
  0xf1   :  { %1093 = vmatmul.msk.f32.gmra.mxu2 %vm176_vm0, %v155_v49 }
  0xf8   :  { %v158_v50 = vpop.f32.mrf.mxu0 }
  0xf9   :  { %1094 = vmatmul.msk.f32.gmra.mxu2 %vm176_vm0, %v158_v50 }
 0x100   :  { %v161_v51 = vpop.f32.mrf.mxu0 }
 0x101   :  { %1095 = vmatmul.msk.f32.gmra.mxu2 %vm176_vm0, %v161_v51 }
 0x108   :  { %v164_v52 = vpop.f32.mrf.mxu0 }
 0x109   :  { %1100 = vmatmul.msk.f32.vlgmr.msrb.gmra.mxu2 %vm176_vm0, %v1417_v15  ;;  %1096 = vmatmul.msk.f32.vlgmr.msra.gmra.mxu3 %vm176_vm0, %v164_v52 }
 0x110   :  { %v167_v53 = vpop.f32.mrf.mxu0 }
 0x111   :  { %1101 = vmatmul.msk.f32.gmra.mxu2 %vm176_vm0, %v1411_v14  ;;  %1097 = vmatmul.msk.f32.gmra.mxu3 %vm176_vm0, %v167_v53 }
 0x118   :  { %v170_v54 = vpop.f32.mrf.mxu0 }
 0x119   :  { %1102 = vmatmul.msk.f32.gmra.mxu2 %vm176_vm0, %v1405_v13  ;;  %1098 = vmatmul.msk.f32.gmra.mxu3 %vm176_vm0, %v170_v54 }
 0x120   :  { %v173_v56 = vpop.f32.mrf.mxu0 }
 0x121   :  { %1103 = vmatmul.msk.f32.gmra.mxu2 %vm176_vm0, %v1399_v12  ;;  %1099 = vmatmul.msk.f32.gmra.mxu3 %vm176_vm0, %v173_v56 }
 0x129   :  { %1104 = vmatmul.msk.f32.gmra.mxu2 %vm176_vm0, %v1393_v11 }
 0x131   :  { %1105 = vmatmul.msk.f32.gmra.mxu2 %vm176_vm0, %v1387_v10 }
 0x139   :  { %1106 = vmatmul.msk.f32.gmra.mxu2 %vm176_vm0, %v1381_v9 }
 0x141   :  { %1107 = vmatmul.msk.f32.gmra.mxu2 %vm176_vm0, %v1375_v8  ;;  %v242_v8 = vpop.f32.mrf.mxu1 }
 0x149   :  { %1108 = vmatmul.msk.f32.gmra.mxu2 %vm176_vm0, %v1369_v7  ;;  %v245_v10 = vpop.f32.mrf.mxu1 }
 0x151   :  { %1109 = vmatmul.msk.f32.gmra.mxu2 %vm176_vm0, %v1363_v6  ;;  %v248_v15 = vpop.f32.mrf.mxu1 }
 0x159   :  { %1110 = vmatmul.msk.f32.gmra.mxu2 %vm176_vm0, %v1357_v5  ;;  %v439_v5 = vld [vmem:[%s1948_s3 + $0x8] sm:$0xff]  ;;  %v251_v33 = vpop.f32.mrf.mxu1 }
 0x15c   :  { %v1554_v55 = vpop.f32.mrf.mxu2 }
 0x161   :  { %1111 = vmatmul.msk.f32.gmra.mxu2 %vm176_vm0, %v1351_v4  ;;  %v440_v4 = vld [vmem:[%s1948_s3 + $0x10] sm:$0xff]  ;;  %v254_v42 = vpop.f32.mrf.mxu1 }
 0x162   :  { %695 = vmatpush.msra.mxu2 %v440_v4 }
 0x164   :  { %v1562_v58 = vpop.f32.mrf.mxu2  ;;  %696 = vmatpush.msra.mxu2 %v439_v5 }
 0x169   :  { %1112 = vmatmul.msk.f32.gmra.mxu2 %vm176_vm0, %v1345_v3  ;;  %v438_v3 = vld [vmem:[%s1948_s3] sm:$0xff]  ;;  %v257_v48 = vpop.f32.mrf.mxu1 }
 0x16a   :  { %697 = vmatpush.msra.mxu2 %v438_v3 }
 0x16c   :  { %v1578_v63 = vpop.f32.mrf.mxu2 }
 0x171   :  { %1113 = vmatmul.msk.f32.gmra.mxu2 %vm176_vm0, %v1339_v2  ;;  %v1600_v2 = vld [vmem:[%s1953_s8] ss:$0 sm:$0xff] }
 0x174   :  { %v269_v6 = vpop.f32.mrf.mxu2 }
 0x179   :  { %1114 = vmatmul.msk.f32.gmra.mxu2 %vm176_vm0, %v1333_v1 }
 0x17c   :  { %v272_v7 = vpop.f32.mrf.mxu2 }
 0x181   :  { %1115 = vmatmul.msk.f32.gmra.mxu2 %vm176_vm0, %v1328_v0 }
 0x184   :  { %v1595_v9 = vpop.f32.mrf.mxu2 }
 0x18c   :  { %v355_v11 = vpop.f32.mrf.mxu2 }
 0x18d   :  { %v356_v12 = vadd.f32 %v355_v11, %v242_v8 }
 0x18f   :  { %v1603_v13 = vadd.f32 %v1600_v2, %v356_v12 }
 0x191   :  { %v422_v1 = vmax.f32 %v1603_v13, 0.0  ;;  %v452_v13 = vld [vmem:[%s1951_s6 + $0x30] sm:$0xff] }
 0x193   :  { %1132 = vmatmul.msk.f32.vlgmr.msra.gmra.mxu2 %vm520_vm1, %v422_v1 }
 0x194   :  { %v358_v0 = vpop.f32.mrf.mxu2 }
 0x195   :  { %v359_v14 = vadd.f32 %v358_v0, %v245_v10 }
 0x197   :  { %v1610_v24 = vadd.f32 %v1600_v2, %v359_v14 }
 0x199   :  { %v423_v25 = vmax.f32 %v1610_v24, 0.0  ;;  %v450_v24 = vld [vmem:[%s1951_s6 + $0x20] sm:$0xff] }
 0x19b   :  { %1133 = vmatmul.msk.f32.gmra.mxu2 %vm520_vm1, %v423_v25 }
 0x19c   :  { %v361_v26 = vpop.f32.mrf.mxu2 }
 0x19d   :  { %v362_v31 = vadd.f32 %v361_v26, %v248_v15  ;;  %v278_v26 = vpop.f32.mrf.mxu3 }
 0x19f   :  { %v1617_v32 = vadd.f32 %v1600_v2, %v362_v31 }
 0x1a1   :  { %v424_v34 = vmax.f32 %v1617_v32, 0.0  ;;  %v448_v32 = vld [vmem:[%s1951_s6 + $0x10] sm:$0xff] }
 0x1a3   :  { %1134 = vmatmul.msk.f32.gmra.mxu2 %vm520_vm1, %v424_v34 }
 0x1a4   :  { %v364_v35 = vpop.f32.mrf.mxu2 }
 0x1a5   :  { %v365_v36 = vadd.f32 %v364_v35, %v251_v33 }
 0x1a7   :  { %v1624_v38 = vadd.f32 %v1600_v2, %v365_v36 }
 0x1a9   :  { %v425_v40 = vmax.f32 %v1624_v38, 0.0  ;;  %v446_v38 = vld [vmem:[%s1951_s6] sm:$0xff] }
 0x1ab   :  { %1135 = vmatmul.msk.f32.gmra.mxu2 %vm520_vm1, %v425_v40 }
 0x1ac   :  { %v367_v43 = vpop.f32.mrf.mxu2 }
 0x1ad   :  { %v368_v45 = vadd.f32 %v367_v43, %v254_v42  ;;  %v281_v42 = vpop.f32.mrf.mxu3 }
 0x1af   :  { %v1631_v46 = vadd.f32 %v1600_v2, %v368_v45 }
 0x1b1   :  { %v426_v47 = vmax.f32 %v1631_v46, 0.0 }
 0x1b3   :  { %1136 = vmatmul.msk.f32.gmra.mxu2 %vm520_vm1, %v426_v47 }
 0x1b4   :  { %v370_v49 = vpop.f32.mrf.mxu2 }
 0x1b5   :  { %v371_v50 = vadd.f32 %v370_v49, %v257_v48 }
 0x1b7   :  { %v1638_v51 = vadd.f32 %v1600_v2, %v371_v50  ;;  %v284_v50 = vpop.f32.mrf.mxu3 }
 0x1b9   :  { %v427_v52 = vmax.f32 %v1638_v51, 0.0 }
 0x1bb   :  { %1137 = vmatmul.msk.f32.gmra.mxu2 %vm520_vm1, %v427_v52 }
 0x1bc   :  { %v373_v53 = vpop.f32.mrf.mxu2 }
 0x1bd   :  { %v374_v54 = vadd.f32 %v373_v53, %v1554_v55 }
 0x1bf   :  { %v412_v56 = vadd.f32 %v1600_v2, %v374_v54 }
 0x1c1   :  { %v428_v57 = vmax.f32 %v412_v56, 0.0 }
 0x1c3   :  { %1138 = vmatmul.msk.f32.gmra.mxu2 %vm520_vm1, %v428_v57 }
 0x1c4   :  { %v376_v59 = vpop.f32.mrf.mxu2 }
 0x1c5   :  { %v377_v60 = vadd.f32 %v376_v59, %v1562_v58 }
 0x1c7   :  { %v413_v61 = vadd.f32 %v1600_v2, %v377_v60  ;;  %v287_v60 = vpop.f32.mrf.mxu3 }
 0x1c9   :  { %v429_v62 = vmax.f32 %v413_v61, 0.0 }
 0x1cb   :  { %1139 = vmatmul.msk.f32.gmra.mxu2 %vm520_vm1, %v429_v62 }
 0x1cc   :  { %v379_v4 = vpop.f32.mrf.mxu2 }
 0x1cd   :  { %v380_v5 = vadd.f32 %v379_v4, %v1578_v63 }
 0x1cf   :  { %v414_v3 = vadd.f32 %v1600_v2, %v380_v5 }
 0x1d1   :  { %v430_v8 = vmax.f32 %v414_v3, 0.0 }
 0x1d3   :  { %1140 = vmatmul.msk.f32.gmra.mxu2 %vm520_vm1, %v430_v8 }
 0x1d4   :  { %v382_v55 = vpop.f32.mrf.mxu2 }
 0x1d5   :  { %v383_v10 = vadd.f32 %v382_v55, %v269_v6 }
 0x1d7   :  { %v415_v11 = vadd.f32 %v1600_v2, %v383_v10  ;;  %v797_v10 = vld [vmem:[%s1952_s7 + $0x38] sm:$0xff] }
 0x1d8   :  { %855 = vmatpush.msrb.mxu0 %v797_v10 }
 0x1d9   :  { %v431_v12 = vmax.f32 %v415_v11, 0.0 }
 0x1db   :  { %1141 = vmatmul.msk.f32.gmra.mxu2 %vm520_vm1, %v431_v12 }
 0x1dc   :  { %v385_v58 = vpop.f32.mrf.mxu2 }
 0x1dd   :  { %v386_v0 = vadd.f32 %v385_v58, %v272_v7  ;;  %v796_v58 = vld [vmem:[%s1952_s7 + $0x30] sm:$0xff] }
 0x1de   :  { %856 = vmatpush.msrb.mxu0 %v796_v58 }
 0x1df   :  { %v416_v14 = vadd.f32 %v1600_v2, %v386_v0 }
 0x1e1   :  { %v432_v15 = vmax.f32 %v416_v14, 0.0  ;;  %v795_v14 = vld [vmem:[%s1952_s7 + $0x28] sm:$0xff] }
 0x1e2   :  { %857 = vmatpush.msrb.mxu0 %v795_v14 }
 0x1e3   :  { %1142 = vmatmul.msk.f32.gmra.mxu2 %vm520_vm1, %v432_v15 }
 0x1e4   :  { %v388_v63 = vpop.f32.mrf.mxu2 }
 0x1e5   :  { %v389_v31 = vadd.f32 %v388_v63, %v1595_v9  ;;  %v793_v63 = vld [vmem:[%s1952_s7 + $0x18] sm:$0xff] }
 0x1e7   :  { %v417_v33 = vadd.f32 %v1600_v2, %v389_v31  ;;  %v792_v31 = vld [vmem:[%s1952_s7 + $0x10] sm:$0xff] }
 0x1e9   :  { %v433_v35 = vmax.f32 %v417_v33, 0.0  ;;  %v788_v33 = vld [vmem:[%s1949_s4 + $0x30] sm:$0xff] }
 0x1eb   :  { %1143 = vmatmul.msk.f32.gmra.mxu2 %vm520_vm1, %v433_v35 }
 0x1ec   :  { %v391_v6 = vpop.f32.mrf.mxu2 }
 0x1ed   :  { %v392_v36 = vadd.f32 %v391_v6, %v278_v26  ;;  %v789_v26 = vld [vmem:[%s1949_s4 + $0x38] sm:$0xff] }
 0x1ef   :  { %v418_v43 = vadd.f32 %v1600_v2, %v392_v36  ;;  %v791_v36 = vld [vmem:[%s1952_s7 + $0x8] sm:$0xff] }
 0x1f1   :  { %v434_v7 = vmax.f32 %v418_v43, 0.0  ;;  %v790_v43 = vld [vmem:[%s1952_s7] sm:$0xff] }
 0x1f3   :  { %1144 = vmatmul.msk.f32.gmra.mxu2 %vm520_vm1, %v434_v7 }
 0x1f4   :  { %v394_v45 = vpop.f32.mrf.mxu2 }
 0x1f5   :  { %v395_v48 = vadd.f32 %v394_v45, %v281_v42  ;;  %v787_v42 = vld [vmem:[%s1949_s4 + $0x28] sm:$0xff]  ;;  %v785_v45 = vld [vmem:[%s1949_s4 + $0x18] sm:$0xff] }
 0x1f7   :  { %v419_v49 = vadd.f32 %v1600_v2, %v395_v48  ;;  %v784_v48 = vld [vmem:[%s1949_s4 + $0x10] sm:$0xff] }
 0x1f9   :  { %v435_v53 = vmax.f32 %v419_v49, 0.0 }
 0x1fb   :  { %1145 = vmatmul.msk.f32.gmra.mxu2 %vm520_vm1, %v435_v53 }
 0x1fc   :  { %v397_v9 = vpop.f32.mrf.mxu2 }
 0x1fd   :  { %v398_v54 = vadd.f32 %v397_v9, %v284_v50  ;;  %v783_v50 = vld [vmem:[%s1949_s4 + $0x8] sm:$0xff] }
 0x1ff   :  { %v420_v56 = vadd.f32 %v1600_v2, %v398_v54 }
 0x201   :  { %v436_v59 = vmax.f32 %v420_v56, 0.0 }
 0x203   :  { %1146 = vmatmul.msk.f32.gmra.mxu2 %vm520_vm1, %v436_v59 }
 0x204   :  { %v400_v61 = vpop.f32.mrf.mxu2 }
 0x205   :  { %v401_v4 = vadd.f32 %v400_v61, %v287_v60  ;;  %v1787_v60 = vld [vmem:[%s1954_s9] ss:$0 sm:$0xff] }
 0x207   :  { %v421_v5 = vadd.f32 %v1600_v2, %v401_v4  ;;  %v453_v2 = vld [vmem:[%s1951_s6 + $0x38] sm:$0xff] }
 0x208   :  { %577 = vmatpush.msrb.mxu1 %v453_v2 }
 0x209   :  { %v437_v3 = vmax.f32 %v421_v5, 0.0 }
 0x20a   :  { %578 = vmatpush.msrb.mxu1 %v452_v13 }
 0x20b   :  { %455 = vmatpush.msrb.mxu3 %v437_v3  ;;  %1147 = vmatmul.msk.f32.gmra.mxu2 %vm520_vm1, %v437_v3 }
 0x20d   :  { %456 = vmatpush.msrb.mxu3 %v436_v59 }
 0x20f   :  { %457 = vmatpush.msrb.mxu3 %v435_v53  ;;  %v782_v53 = vld [vmem:[%s1949_s4] sm:$0xff] }
 0x211   :  { %458 = vmatpush.msrb.mxu3 %v434_v7  ;;  %v786_v7 = vld [vmem:[%s1949_s4 + $0x20] sm:$0xff] }
 0x213   :  { %459 = vmatpush.msrb.mxu3 %v433_v35 }
 0x215   :  { %460 = vmatpush.msrb.mxu3 %v432_v15  ;;  %v794_v15 = vld [vmem:[%s1952_s7 + $0x20] sm:$0xff] }
 0x216   :  { %858 = vmatpush.msrb.mxu0 %v794_v15  ;;  %v699_v35 = vpop.f32.mrf.mxu2 }
 0x217   :  { %461 = vmatpush.msrb.mxu3 %v431_v12 }
 0x218   :  { %859 = vmatpush.msrb.mxu0 %v793_v63 }
 0x219   :  { %462 = vmatpush.msrb.mxu3 %v430_v8 }
 0x21a   :  { %860 = vmatpush.msrb.mxu0 %v792_v31 }
 0x21b   :  { %463 = vmatpush.msrb.mxu3 %v429_v62 }
 0x21c   :  { %861 = vmatpush.msrb.mxu0 %v791_v36 }
 0x21d   :  { %464 = vmatpush.msrb.mxu3 %v428_v57 }
 0x21e   :  { %862 = vmatpush.msrb.mxu0 %v790_v43  ;;  %v702_v9 = vpop.f32.mrf.mxu2 }
 0x21f   :  { %465 = vmatpush.msrb.mxu3 %v427_v52 }
 0x220   :  { %985 = vmatpush.msra.mxu0 %v789_v26 }
 0x221   :  { %466 = vmatpush.msrb.mxu3 %v426_v47 }
 0x222   :  { %986 = vmatpush.msra.mxu0 %v788_v33 }
 0x223   :  { %467 = vmatpush.msrb.mxu3 %v425_v40 }
 0x224   :  { %987 = vmatpush.msra.mxu0 %v787_v42 }
 0x225   :  { %468 = vmatpush.msrb.mxu3 %v424_v34  ;;  %v447_v34 = vld [vmem:[%s1951_s6 + $0x8] sm:$0xff] }
 0x226   :  { %988 = vmatpush.msra.mxu0 %v786_v7  ;;  %v705_v56 = vpop.f32.mrf.mxu2 }
 0x227   :  { %469 = vmatpush.msrb.mxu3 %v423_v25  ;;  %v449_v25 = vld [vmem:[%s1951_s6 + $0x18] sm:$0xff] }
 0x228   :  { %989 = vmatpush.msra.mxu0 %v785_v45 }
 0x229   :  { %470 = vmatpush.msrb.mxu3 %v422_v1  ;;  %v451_v1 = vld [vmem:[%s1951_s6 + $0x28] sm:$0xff] }
 0x22a   :  { %471 = vmatmul.f32.vlgmr.msrb.gmra.mxu3 %v1423_v16  ;;  %579 = vmatpush.msrb.mxu1 %v451_v1 }
 0x22b   :  { %990 = vmatpush.msra.mxu0 %v784_v48 }
 0x22c   :  { %580 = vmatpush.msrb.mxu1 %v450_v24 }
 0x22d   :  { %991 = vmatpush.msra.mxu0 %v783_v50 }
 0x22e   :  { %581 = vmatpush.msrb.mxu1 %v449_v25  ;;  %v708_v61 = vpop.f32.mrf.mxu2 }
 0x22f   :  { %992 = vmatpush.msra.mxu0 %v782_v53 }
 0x230   :  { %582 = vmatpush.msrb.mxu1 %v448_v32 }
 0x232   :  { %474 = vmatmul.f32.gmra.mxu3 %v1430_v17  ;;  %583 = vmatpush.msrb.mxu1 %v447_v34 }
 0x234   :  { %584 = vmatpush.msrb.mxu1 %v446_v38 }
 0x236   :  { %1188 = vmatpush.msra.mxu1 %v789_v26  ;;  %v711_v24 = vpop.f32.mrf.mxu2 }
 0x238   :  { %1189 = vmatpush.msra.mxu1 %v788_v33 }
 0x23a   :  { %477 = vmatmul.f32.gmra.mxu3 %v1436_v18  ;;  %1190 = vmatpush.msra.mxu1 %v787_v42 }
 0x23c   :  { %1191 = vmatpush.msra.mxu1 %v786_v7 }
 0x23e   :  { %1192 = vmatpush.msra.mxu1 %v785_v45 }
 0x240   :  { %1193 = vmatpush.msra.mxu1 %v784_v48 }
 0x242   :  { %480 = vmatmul.f32.gmra.mxu3 %v1442_v19  ;;  %1194 = vmatpush.msra.mxu1 %v783_v50 }
 0x244   :  { %1195 = vmatpush.msra.mxu1 %v782_v53 }
 0x24a   :  { %483 = vmatmul.f32.gmra.mxu3 %v1448_v20 }
 0x252   :  { %486 = vmatmul.f32.gmra.mxu3 %v1454_v21 }
 0x25a   :  { %489 = vmatmul.f32.gmra.mxu3 %v1460_v22 }
 0x262   :  { %492 = vmatmul.f32.gmra.mxu3 %v1466_v23 }
 0x26a   :  { %495 = vmatmul.f32.gmra.mxu3 %v1472_v27 }
 0x272   :  { %498 = vmatmul.f32.gmra.mxu3 %v1478_v28 }
 0x27a   :  { %501 = vmatmul.f32.gmra.mxu3 %v1484_v29 }
 0x282   :  { %504 = vmatmul.f32.gmra.mxu3 %v1490_v30 }
 0x28a   :  { %507 = vmatmul.f32.gmra.mxu3 %v1501_v37 }
 0x292   :  { %510 = vmatmul.f32.gmra.mxu3 %v1508_v39 }
 0x29a   :  { %513 = vmatmul.f32.gmra.mxu3 %v1515_v41 }
 0x2a2   :  { %516 = vmatmul.f32.gmra.mxu3 %v1522_v44 }
 0x2ad   :  { %v472_v40 = vpop.f32.mrf.mxu3 }
 0x2ae   :  { %1116 = vmatmul.msk.f32.vlgmr.msrb.gmra.mxu1 %vm520_vm1, %v472_v40 }
 0x2b5   :  { %v475_v46 = vpop.f32.mrf.mxu3 }
 0x2b6   :  { %1117 = vmatmul.msk.f32.gmra.mxu1 %vm520_vm1, %v475_v46  ;;  %v714_v46 = vpop.f32.mrf.mxu2 }
 0x2bd   :  { %v478_v47 = vpop.f32.mrf.mxu3 }
 0x2be   :  { %1118 = vmatmul.msk.f32.gmra.mxu1 %vm520_vm1, %v478_v47 }
 0x2c5   :  { %v481_v51 = vpop.f32.mrf.mxu3 }
 0x2c6   :  { %1119 = vmatmul.msk.f32.gmra.mxu1 %vm520_vm1, %v481_v51 }
 0x2cd   :  { %v484_v52 = vpop.f32.mrf.mxu3 }
 0x2ce   :  { %1120 = vmatmul.msk.f32.gmra.mxu1 %vm520_vm1, %v484_v52 }
 0x2d5   :  { %v487_v57 = vpop.f32.mrf.mxu3 }
 0x2d6   :  { %1121 = vmatmul.msk.f32.gmra.mxu1 %vm520_vm1, %v487_v57 }
 0x2dd   :  { %v490_v62 = vpop.f32.mrf.mxu3 }
 0x2de   :  { %1122 = vmatmul.msk.f32.gmra.mxu1 %vm520_vm1, %v490_v62 }
 0x2e5   :  { %v493_v8 = vpop.f32.mrf.mxu3 }
 0x2e6   :  { %1123 = vmatmul.msk.f32.gmra.mxu1 %vm520_vm1, %v493_v8  ;;  %v717_v8 = vpop.f32.mrf.mxu2 }
 0x2ed   :  { %v496_v55 = vpop.f32.mrf.mxu3 }
 0x2ee   :  { %1124 = vmatmul.msk.f32.gmra.mxu1 %vm520_vm1, %v496_v55  ;;  %v720_v58 = vpop.f32.mrf.mxu2 }
 0x2f5   :  { %v499_v11 = vpop.f32.mrf.mxu3 }
 0x2f6   :  { %1125 = vmatmul.msk.f32.gmra.mxu1 %vm520_vm1, %v499_v11  ;;  %v723_v33 = vpop.f32.mrf.mxu2 }
 0x2fd   :  { %v502_v12 = vpop.f32.mrf.mxu3 }
 0x2fe   :  { %1126 = vmatmul.msk.f32.gmra.mxu1 %vm520_vm1, %v502_v12  ;;  %v726_v7 = vpop.f32.mrf.mxu2 }
 0x305   :  { %v505_v0 = vpop.f32.mrf.mxu3 }
 0x306   :  { %1127 = vmatmul.msk.f32.gmra.mxu1 %vm520_vm1, %v505_v0 }
 0x30d   :  { %v508_v6 = vpop.f32.mrf.mxu3 }
 0x30e   :  { %1128 = vmatmul.msk.f32.gmra.mxu1 %vm520_vm1, %v508_v6 }
 0x315   :  { %v511_v49 = vpop.f32.mrf.mxu3 }
 0x316   :  { %1129 = vmatmul.msk.f32.gmra.mxu1 %vm520_vm1, %v511_v49 }
 0x31d   :  { %v514_v54 = vpop.f32.mrf.mxu3 }
 0x31e   :  { %1130 = vmatmul.msk.f32.gmra.mxu1 %vm520_vm1, %v514_v54 }
 0x325   :  { %v517_v59 = vpop.f32.mrf.mxu3 }
 0x326   :  { %1131 = vmatmul.msk.f32.gmra.mxu1 %vm520_vm1, %v517_v59 }
 0x32b   :  { %v586_v4 = vpop.f32.mrf.mxu1 }
 0x32c   :  { %v700_v5 = vadd.f32 %v699_v35, %v586_v4 }
 0x32e   :  { %v1790_v3 = vadd.f32 %v1787_v60, %v700_v5 }
 0x330   :  { %v766_v2 = vmax.f32 %v1790_v3, 0.0 }
 0x332   :  { %1148 = vmatmul.msk.f32.vlgmr.msrb.gmra.mxu0 %vm520_vm1, %v766_v2 }
 0x333   :  { %v589_v13 = vpop.f32.mrf.mxu1 }
 0x334   :  { %v703_v1 = vadd.f32 %v702_v9, %v589_v13  ;;  %v729_v9 = vpop.f32.mrf.mxu2 }
 0x336   :  { %v751_v25 = vadd.f32 %v1787_v60, %v703_v1 }
 0x338   :  { %v767_v32 = vmax.f32 %v751_v25, 0.0 }
 0x33a   :  { %1149 = vmatmul.msk.f32.gmra.mxu0 %vm520_vm1, %v767_v32  ;;  %1165 = vmatmul.msk.f32.vlgmr.msra.gmra.mxu1 %vm520_vm1, %v767_v32 }
 0x33b   :  { %v592_v34 = vpop.f32.mrf.mxu1 }
 0x33c   :  { %v706_v38 = vadd.f32 %v705_v56, %v592_v34  ;;  %v732_v4 = vpop.f32.mrf.mxu2 }
 0x33e   :  { %v752_v40 = vadd.f32 %v1787_v60, %v706_v38 }
 0x340   :  { %v768_v47 = vmax.f32 %v752_v40, 0.0 }
 0x342   :  { %1150 = vmatmul.msk.f32.gmra.mxu0 %vm520_vm1, %v768_v47  ;;  %1166 = vmatmul.msk.f32.gmra.mxu1 %vm520_vm1, %v768_v47 }
 0x343   :  { %v595_v51 = vpop.f32.mrf.mxu1 }
 0x344   :  { %v709_v52 = vadd.f32 %v708_v61, %v595_v51  ;;  %v735_v34 = vpop.f32.mrf.mxu2 }
 0x346   :  { %v753_v57 = vadd.f32 %v1787_v60, %v709_v52 }
 0x348   :  { %v769_v62 = vmax.f32 %v753_v57, 0.0 }
 0x34a   :  { %1151 = vmatmul.msk.f32.gmra.mxu0 %vm520_vm1, %v769_v62  ;;  %1167 = vmatmul.msk.f32.gmra.mxu1 %vm520_vm1, %v769_v62 }
 0x34b   :  { %v598_v55 = vpop.f32.mrf.mxu1 }
 0x34c   :  { %v712_v10 = vadd.f32 %v711_v24, %v598_v55  ;;  %v738_v52 = vpop.f32.mrf.mxu2 }
 0x34e   :  { %v754_v11 = vadd.f32 %v1787_v60, %v712_v10 }
 0x350   :  { %v770_v12 = vmax.f32 %v754_v11, 0.0 }
 0x352   :  { %1152 = vmatmul.msk.f32.gmra.mxu0 %vm520_vm1, %v770_v12  ;;  %1168 = vmatmul.msk.f32.gmra.mxu1 %vm520_vm1, %v770_v12 }
 0x353   :  { %v601_v0 = vpop.f32.mrf.mxu1 }
 0x354   :  { %v715_v14 = vadd.f32 %v714_v46, %v601_v0  ;;  %v741_v11 = vpop.f32.mrf.mxu2 }
 0x356   :  { %v755_v15 = vadd.f32 %v1787_v60, %v715_v14 }
 0x358   :  { %v771_v63 = vmax.f32 %v755_v15, 0.0 }
 0x35a   :  { %1153 = vmatmul.msk.f32.gmra.mxu0 %vm520_vm1, %v771_v63  ;;  %1169 = vmatmul.msk.f32.gmra.mxu1 %vm520_vm1, %v771_v63 }
 0x35b   :  { %v604_v26 = vpop.f32.mrf.mxu1 }
 0x35c   :  { %v718_v31 = vadd.f32 %v717_v8, %v604_v26  ;;  %v744_v15 = vpop.f32.mrf.mxu2 }
 0x35e   :  { %v756_v35 = vadd.f32 %v1787_v60, %v718_v31 }
 0x360   :  { %v772_v6 = vmax.f32 %v756_v35, 0.0 }
 0x362   :  { %1154 = vmatmul.msk.f32.gmra.mxu0 %vm520_vm1, %v772_v6  ;;  %1170 = vmatmul.msk.f32.gmra.mxu1 %vm520_vm1, %v772_v6 }
 0x363   :  { %v607_v36 = vpop.f32.mrf.mxu1 }
 0x364   :  { %v721_v42 = vadd.f32 %v720_v58, %v607_v36 }
 0x366   :  { %v757_v43 = vadd.f32 %v1787_v60, %v721_v42 }
 0x368   :  { %v773_v45 = vmax.f32 %v757_v43, 0.0 }
 0x36a   :  { %1155 = vmatmul.msk.f32.gmra.mxu0 %vm520_vm1, %v773_v45  ;;  %1171 = vmatmul.msk.f32.gmra.mxu1 %vm520_vm1, %v773_v45 }
 0x36b   :  { %v610_v48 = vpop.f32.mrf.mxu1 }
 0x36c   :  { %v724_v49 = vadd.f32 %v723_v33, %v610_v48 }
 0x36e   :  { %v758_v50 = vadd.f32 %v1787_v60, %v724_v49 }
 0x370   :  { %v774_v53 = vmax.f32 %v758_v50, 0.0 }
 0x372   :  { %1156 = vmatmul.msk.f32.gmra.mxu0 %vm520_vm1, %v774_v53  ;;  %1172 = vmatmul.msk.f32.gmra.mxu1 %vm520_vm1, %v774_v53 }
 0x373   :  { %v613_v54 = vpop.f32.mrf.mxu1 }
 0x374   :  { %v727_v56 = vadd.f32 %v726_v7, %v613_v54 }
 0x376   :  { %v759_v59 = vadd.f32 %v1787_v60, %v727_v56 }
 0x378   :  { %v775_v61 = vmax.f32 %v759_v59, 0.0 }
 0x37a   :  { %1157 = vmatmul.msk.f32.gmra.mxu0 %vm520_vm1, %v775_v61  ;;  %1173 = vmatmul.msk.f32.gmra.mxu1 %vm520_vm1, %v775_v61 }
 0x37b   :  { %v616_v5 = vpop.f32.mrf.mxu1 }
 0x37c   :  { %v730_v13 = vadd.f32 %v729_v9, %v616_v5 }
 0x37e   :  { %v760_v1 = vadd.f32 %v1787_v60, %v730_v13 }
 0x380   :  { %v776_v24 = vmax.f32 %v760_v1, 0.0 }
 0x382   :  { %1158 = vmatmul.msk.f32.gmra.mxu0 %vm520_vm1, %v776_v24  ;;  %1174 = vmatmul.msk.f32.gmra.mxu1 %vm520_vm1, %v776_v24 }
 0x383   :  { %v619_v25 = vpop.f32.mrf.mxu1 }
 0x384   :  { %v733_v32 = vadd.f32 %v732_v4, %v619_v25 }
 0x386   :  { %v761_v38 = vadd.f32 %v1787_v60, %v733_v32 }
 0x388   :  { %v777_v40 = vmax.f32 %v761_v38, 0.0 }
 0x38a   :  { %1159 = vmatmul.msk.f32.gmra.mxu0 %vm520_vm1, %v777_v40  ;;  %1175 = vmatmul.msk.f32.gmra.mxu1 %vm520_vm1, %v777_v40 }
 0x38b   :  { %v622_v46 = vpop.f32.mrf.mxu1 }
 0x38c   :  { %v736_v47 = vadd.f32 %v735_v34, %v622_v46 }
 0x38e   :  { %v762_v51 = vadd.f32 %v1787_v60, %v736_v47 }
 0x390   :  { %v778_v57 = vmax.f32 %v762_v51, 0.0 }
 0x392   :  { %1160 = vmatmul.msk.f32.gmra.mxu0 %vm520_vm1, %v778_v57  ;;  %1176 = vmatmul.msk.f32.gmra.mxu1 %vm520_vm1, %v778_v57 }
 0x393   :  { %v625_v62 = vpop.f32.mrf.mxu1 }
 0x394   :  { %v739_v8 = vadd.f32 %v738_v52, %v625_v62 }
 0x396   :  { %v763_v55 = vadd.f32 %v1787_v60, %v739_v8 }
 0x398   :  { %v779_v10 = vmax.f32 %v763_v55, 0.0 }
 0x39a   :  { %1161 = vmatmul.msk.f32.gmra.mxu0 %vm520_vm1, %v779_v10  ;;  %1177 = vmatmul.msk.f32.gmra.mxu1 %vm520_vm1, %v779_v10 }
 0x39b   :  { %v628_v12 = vpop.f32.mrf.mxu1 }
 0x39c   :  { %v742_v58 = vadd.f32 %v741_v11, %v628_v12 }
 0x39e   :  { %v764_v0 = vadd.f32 %v1787_v60, %v742_v58 }
 0x3a0   :  { %v780_v14 = vmax.f32 %v764_v0, 0.0 }
 0x3a2   :  { %1162 = vmatmul.msk.f32.gmra.mxu0 %vm520_vm1, %v780_v14  ;;  %1178 = vmatmul.msk.f32.gmra.mxu1 %vm520_vm1, %v780_v14 }
 0x3a3   :  { %v631_v63 = vpop.f32.mrf.mxu1 }
 0x3a4   :  { %v745_v26 = vadd.f32 %v744_v15, %v631_v63 }
 0x3a6   :  { %v765_v31 = vadd.f32 %v1787_v60, %v745_v26 }
 0x3a8   :  { %v781_v33 = vmax.f32 %v765_v31, 0.0 }
 0x3aa   :  { %1163 = vmatmul.msk.f32.gmra.mxu0 %vm520_vm1, %v781_v33  ;;  %1179 = vmatmul.msk.f32.gmra.mxu1 %vm520_vm1, %v781_v33 }
 0x3af   :  { %v864_v35 = vpop.f32.mrf.mxu0 }
 0x3b2   :  { %1164 = vmatmul.msk.f32.vlgmr.msra.gmra.mxu0 %vm520_vm1, %v766_v2 }
 0x3b7   :  { %v867_v6 = vpop.f32.mrf.mxu0 }
 0x3bf   :  { %v870_v36 = vpop.f32.mrf.mxu0 }
 0x3c7   :  { %v873_v42 = vpop.f32.mrf.mxu0 }
 0x3cf   :  { %v876_v43 = vpop.f32.mrf.mxu0 }
 0x3d7   :  { %v879_v7 = vpop.f32.mrf.mxu0 }
 0x3df   :  { %v882_v45 = vpop.f32.mrf.mxu0 }
 0x3e7   :  { %v885_v48 = vpop.f32.mrf.mxu0 }
 0x3ef   :  { %v888_v49 = vpop.f32.mrf.mxu0 }
 0x3f7   :  { %v891_v50 = vpop.f32.mrf.mxu0 }
 0x3ff   :  { %v894_v60 = vpop.f32.mrf.mxu0 }
 0x407   :  { %v897_v53 = vpop.f32.mrf.mxu0 }
 0x40f   :  { %v900_v9 = vpop.f32.mrf.mxu0 }
 0x417   :  { %v903_v54 = vpop.f32.mrf.mxu0 }
 0x41f   :  { %v906_v56 = vpop.f32.mrf.mxu0 }
 0x427   :  { %v909_v59 = vpop.f32.mrf.mxu0 }
 0x428   :  { %912 = vmatpush.msra.mxu3 %v909_v59 }
 0x42a   :  { %913 = vmatpush.msra.mxu3 %v906_v56 }
 0x42c   :  { %914 = vmatpush.msra.mxu3 %v903_v54 }
 0x42e   :  { %915 = vmatpush.msra.mxu3 %v900_v9 }
 0x430   :  { %916 = vmatpush.msra.mxu3 %v897_v53 }
 0x432   :  { %917 = vmatpush.msra.mxu3 %v894_v60 }
 0x434   :  { %918 = vmatpush.msra.mxu3 %v891_v50 }
 0x436   :  { %919 = vmatpush.msra.mxu3 %v888_v49 }
 0x438   :  { %920 = vmatpush.msra.mxu3 %v885_v48 }
 0x43a   :  { %921 = vmatpush.msra.mxu3 %v882_v45 }
 0x43c   :  { %922 = vmatpush.msra.mxu3 %v879_v7 }
 0x43e   :  { %923 = vmatpush.msra.mxu3 %v876_v43 }
 0x440   :  { %924 = vmatpush.msra.mxu3 %v873_v42 }
 0x442   :  { %925 = vmatpush.msra.mxu3 %v870_v36 }
 0x444   :  { %926 = vmatpush.msra.mxu3 %v867_v6 }
 0x446   :  { %927 = vmatpush.msra.mxu3 %v864_v35 }
 0x447   :  { %928 = vmatmul.f32.vlgmr.msra.gmra.mxu3 %v1423_v16  ;;  %v997_v16 = vpop.f32.mrf.mxu1 }
 0x44f   :  { %931 = vmatmul.f32.gmra.mxu3 %v1430_v17  ;;  %v1000_v17 = vpop.f32.mrf.mxu1 }
 0x457   :  { %934 = vmatmul.f32.gmra.mxu3 %v1436_v18  ;;  %v1003_v18 = vpop.f32.mrf.mxu1 }
 0x45f   :  { %937 = vmatmul.f32.gmra.mxu3 %v1442_v19  ;;  %v1863_v19 = vld [vmem:[%s1955_s10] ss:$0 sm:$0xff] }
 0x467   :  { %940 = vmatmul.f32.gmra.mxu3 %v1448_v20  ;;  %v994_v20 = vpop.f32.mrf.mxu0 }
 0x46f   :  { %943 = vmatmul.f32.gmra.mxu3 %v1454_v21 }
 0x477   :  { %946 = vmatmul.f32.gmra.mxu3 %v1460_v22 }
 0x47f   :  { %949 = vmatmul.f32.gmra.mxu3 %v1466_v23 }
 0x487   :  { %952 = vmatmul.f32.gmra.mxu3 %v1472_v27 }
 0x48f   :  { %955 = vmatmul.f32.gmra.mxu3 %v1478_v28 }
 0x497   :  { %958 = vmatmul.f32.gmra.mxu3 %v1484_v29  ;;  %v1006_v29 = vpop.f32.mrf.mxu1 }
 0x49f   :  { %961 = vmatmul.f32.gmra.mxu3 %v1490_v30 }
 0x4a7   :  { %964 = vmatmul.f32.gmra.mxu3 %v1501_v37 }
 0x4af   :  { %967 = vmatmul.f32.gmra.mxu3 %v1508_v39 }
 0x4b7   :  { %970 = vmatmul.f32.gmra.mxu3 %v1515_v41 }
 0x4bf   :  { %973 = vmatmul.f32.gmra.mxu3 %v1522_v44  ;;  %v1009_v44 = vpop.f32.mrf.mxu1 }
 0x4c7   :  { %v1012_v4 = vpop.f32.mrf.mxu1 }
 0x4ca   :  { %v929_v21 = vpop.f32.mrf.mxu3 }
 0x4cb   :  { %v995_v22 = vadd.f32 %v994_v20, %v929_v21 }
 0x4cd   :  { %v1045_v23 = vadd.f32 %v1863_v19, %v995_v22 }
 0x4cf   :  { %1062 = vst.msk [vmem:[%s1956_s11] sm:$0xff] %vm1061_vm2, %v1045_v23  ;;  %v1015_v24 = vpop.f32.mrf.mxu1 }
 0x4d2   :  { %v932_v27 = vpop.f32.mrf.mxu3 }
 0x4d3   :  { %v998_v28 = vadd.f32 %v997_v16, %v932_v27 }
 0x4d5   :  { %v1046_v30 = vadd.f32 %v1863_v19, %v998_v28 }
 0x4d7   :  { %1063 = vst.msk [vmem:[%s1956_s11 + $0x8] sm:$0xff] %vm1061_vm2, %v1046_v30  ;;  %v1018_v46 = vpop.f32.mrf.mxu1 }
 0x4da   :  { %v935_v37 = vpop.f32.mrf.mxu3 }
 0x4db   :  { %v1001_v39 = vadd.f32 %v1000_v17, %v935_v37 }
 0x4dd   :  { %v1047_v41 = vadd.f32 %v1863_v19, %v1001_v39 }
 0x4df   :  { %1064 = vst.msk [vmem:[%s1956_s11 + $0x10] sm:$0xff] %vm1061_vm2, %v1047_v41  ;;  %v1021_v62 = vpop.f32.mrf.mxu1 }
 0x4e2   :  { %v938_v3 = vpop.f32.mrf.mxu3 }
 0x4e3   :  { %v1004_v2 = vadd.f32 %v1003_v18, %v938_v3 }
 0x4e5   :  { %v1048_v61 = vadd.f32 %v1863_v19, %v1004_v2 }
 0x4e7   :  { %1065 = vst.msk [vmem:[%s1956_s11 + $0x18] sm:$0xff] %vm1061_vm2, %v1048_v61  ;;  %v1024_v11 = vpop.f32.mrf.mxu1 }
 0x4ea   :  { %v941_v5 = vpop.f32.mrf.mxu3 }
 0x4eb   :  { %v1007_v13 = vadd.f32 %v1006_v29, %v941_v5 }
 0x4ed   :  { %v1049_v1 = vadd.f32 %v1863_v19, %v1007_v13 }
 0x4ef   :  { %1066 = vst.msk [vmem:[%s1956_s11 + $0x20] sm:$0xff] %vm1061_vm2, %v1049_v1  ;;  %v1027_v14 = vpop.f32.mrf.mxu1 }
 0x4f2   :  { %v944_v25 = vpop.f32.mrf.mxu3 }
 0x4f3   :  { %v1010_v32 = vadd.f32 %v1009_v44, %v944_v25 }
 0x4f5   :  { %v1050_v34 = vadd.f32 %v1863_v19, %v1010_v32 }
 0x4f7   :  { %1067 = vst.msk [vmem:[%s1956_s11 + $0x28] sm:$0xff] %vm1061_vm2, %v1050_v34  ;;  %v1030_v35 = vpop.f32.mrf.mxu1 }
 0x4fa   :  { %v947_v38 = vpop.f32.mrf.mxu3 }
 0x4fb   :  { %v1013_v40 = vadd.f32 %v1012_v4, %v947_v38 }
 0x4fd   :  { %v1051_v47 = vadd.f32 %v1863_v19, %v1013_v40 }
 0x4ff   :  { %1068 = vst.msk [vmem:[%s1956_s11 + $0x30] sm:$0xff] %vm1061_vm2, %v1051_v47  ;;  %v1033_v7 = vpop.f32.mrf.mxu1 }
 0x502   :  { %v950_v51 = vpop.f32.mrf.mxu3 }
 0x503   :  { %v1016_v52 = vadd.f32 %v1015_v24, %v950_v51 }
 0x505   :  { %v1052_v57 = vadd.f32 %v1863_v19, %v1016_v52 }
 0x507   :  { %1069 = vst.msk [vmem:[%s1956_s11 + $0x38] sm:$0xff] %vm1061_vm2, %v1052_v57  ;;  %v1036_v50 = vpop.f32.mrf.mxu1 }
 0x50a   :  { %v953_v8 = vpop.f32.mrf.mxu3 }
 0x50b   :  { %v1019_v55 = vadd.f32 %v1018_v46, %v953_v8 }
 0x50d   :  { %v1053_v10 = vadd.f32 %v1863_v19, %v1019_v55 }
 0x50f   :  { %1070 = vst.msk [vmem:[%s1956_s11 + $0x40] sm:$0xff] %vm1061_vm2, %v1053_v10  ;;  %v1039_v54 = vpop.f32.mrf.mxu1 }
 0x512   :  { %v956_v12 = vpop.f32.mrf.mxu3 }
 0x513   :  { %v1022_v58 = vadd.f32 %v1021_v62, %v956_v12 }
 0x515   :  { %v1054_v0 = vadd.f32 %v1863_v19, %v1022_v58 }
 0x517   :  { %1071 = vst.msk [vmem:[%s1956_s11 + $0x48] sm:$0xff] %vm1061_vm2, %v1054_v0 }
 0x51a   :  { %v959_v15 = vpop.f32.mrf.mxu3 }
 0x51b   :  { %v1025_v63 = vadd.f32 %v1024_v11, %v959_v15 }
 0x51d   :  { %v1055_v26 = vadd.f32 %v1863_v19, %v1025_v63 }
 0x51f   :  { %1072 = vst.msk [vmem:[%s1956_s11 + $0x50] sm:$0xff] %vm1061_vm2, %v1055_v26 }
 0x522   :  { %v962_v31 = vpop.f32.mrf.mxu3 }
 0x523   :  { %v1028_v33 = vadd.f32 %v1027_v14, %v962_v31 }
 0x525   :  { %v1056_v6 = vadd.f32 %v1863_v19, %v1028_v33 }
 0x527   :  { %1073 = vst.msk [vmem:[%s1956_s11 + $0x58] sm:$0xff] %vm1061_vm2, %v1056_v6 }
 0x52a   :  { %v965_v36 = vpop.f32.mrf.mxu3 }
 0x52b   :  { %v1031_v42 = vadd.f32 %v1030_v35, %v965_v36 }
 0x52d   :  { %v1057_v43 = vadd.f32 %v1863_v19, %v1031_v42 }
 0x52f   :  { %1074 = vst.msk [vmem:[%s1956_s11 + $0x60] sm:$0xff] %vm1061_vm2, %v1057_v43 }
 0x532   :  { %v968_v45 = vpop.f32.mrf.mxu3 }
 0x533   :  { %v1034_v48 = vadd.f32 %v1033_v7, %v968_v45 }
 0x535   :  { %v1058_v49 = vadd.f32 %v1863_v19, %v1034_v48 }
 0x537   :  { %1075 = vst.msk [vmem:[%s1956_s11 + $0x68] sm:$0xff] %vm1061_vm2, %v1058_v49 }
 0x53a   :  { %v971_v60 = vpop.f32.mrf.mxu3 }
 0x53b   :  { %v1037_v53 = vadd.f32 %v1036_v50, %v971_v60 }
 0x53d   :  { %v1059_v9 = vadd.f32 %v1863_v19, %v1037_v53 }
 0x53f   :  { %1076 = vst.msk [vmem:[%s1956_s11 + $0x70] sm:$0xff] %vm1061_vm2, %v1059_v9 }
 0x542   :  { %v974_v56 = vpop.f32.mrf.mxu3 }
 0x543   :  { %v1040_v59 = vadd.f32 %v1039_v54, %v974_v56 }
 0x545   :  { %v1060_v16 = vadd.f32 %v1863_v19, %v1040_v59 }
 0x547   :  { %1077 = vst.msk [vmem:[%s1956_s11 + $0x78] sm:$0xff] %vm1061_vm2, %v1060_v16 }
 0x548   :  { %1082 = vsyncpa [#allocation3], 1 }
 0x549   :  { %1083 = vsyncpa [#allocation5], 1 }

</bundles_post_ra>
